<compile_context>
chip_gen: v7x
topology: tpu7x:2x2x1
jax: 0.10.0
libtpu: 0.0.40
codegen_flags: <defaults>
</compile_context>

<pallas_src>
import jax
import jax.numpy as jnp
from jax.experimental import pallas as pl
from jax.experimental.pallas import tpu as pltpu

# Fixed Sobel-like filter taps (match the PyTorch module exactly).
GX = ((2.0, 0.0, -2.0), (4.0, 0.0, -4.0), (2.0, 0.0, -2.0))
GY = ((2.0, 4.0, 2.0), (0.0, 0.0, 0.0), (-2.0, -4.0, -2.0))


def _shift_left(x, k):
    """out[..., j] = x[..., (j + k) % W]  (explicit lane rotation, static k)."""
    return jnp.concatenate([x[..., k:], x[..., :k]], axis=-1)


def _sobel_kernel(x_ref, o_ref):
    # x_ref: (Bn, 1, H, W) f32    o_ref: (Bn, 1, H-2, W) f32
    H = x_ref.shape[2]
    Ho = H - 2

    img = x_ref[...].astype(jnp.float32)              # (Bn, 1, H, W)

    # Vertical (sublane-shift) pass — cheap static slices along H.
    top = img[:, :, 0:Ho, :]
    mid = img[:, :, 1:Ho + 1, :]
    bot = img[:, :, 2:Ho + 2, :]
    sy = top + 2.0 * mid + bot                        # [1,2,1] vertical (Gx)
    dy = top - bot                                    # [1,0,-1] vertical (Gy)

    # Horizontal (lane-shift) pass — only two shifted operands needed.
    gx2 = sy - _shift_left(sy, 2)                               # [1,0,-1]
    gy2 = dy + 2.0 * _shift_left(dy, 1) + _shift_left(dy, 2)    # [1,2,1]

    # |grad| = sqrt((2*gx2)^2 + (2*gy2)^2) = 2*sqrt(gx2^2 + gy2^2)
    mag = 2.0 * jnp.sqrt(gx2 * gx2 + gy2 * gy2)       # (Bn, 1, Ho, W)

    # Full-width (lane-dense) store; columns [W-2, W) are wraparound garbage
    # and are sliced off in the wrapper.
    o_ref[...] = mag.astype(o_ref.dtype)


def _pick_batch_block(n, h, w, budget_bytes=8 * 1024 * 1024):
    """Largest divisor of n whose double-buffered in+out footprint fits."""
    per_image = (h * w + (h - 2) * w) * 4             # f32 input + output
    bn = max(1, min(n, budget_bytes // max(2 * per_image, 1)))
    while n % bn != 0:
        bn -= 1
    return bn


def sobel_pallas(img):
    """img: (N, 1, H, W) float32 -> (N, 1, H-2, W-2) float32."""
    N, C, H, W = img.shape
    assert C == 1, "Sobel module expects a single input channel"
    Ho, Wo = H - 2, W - 2

    bn = _pick_batch_block(N, H, W)
    # TODO(synk): for very large images (single in+out image > ~8 MiB) switch
    # to row tiling with a 2-row halo instead of whole-image blocks.

    out_full = pl.pallas_call(
        _sobel_kernel,
        out_shape=jax.ShapeDtypeStruct((N, 1, Ho, W), img.dtype),
        grid_spec=pltpu.PrefetchScalarGridSpec(
            num_scalar_prefetch=0,
            grid=(N // bn,),
            in_specs=[pl.BlockSpec((bn, 1, H, W), lambda n: (n, 0, 0, 0))],
            out_specs=pl.BlockSpec((bn, 1, Ho, W), lambda n: (n, 0, 0, 0)),
        ),
        compiler_params=pltpu.CompilerParams(
            dimension_semantics=("parallel",)),
    )(img)

    # Drop the 2 garbage columns produced by the full-width store.
    return out_full[:, :, :, :Wo]


def sobel_reference(img):
    """Pure-JAX reference mirroring the PyTorch forward."""
    gx_w = jnp.array(GX, jnp.float32)
    gy_w = jnp.array(GY, jnp.float32)
    w = jnp.stack([gx_w, gy_w], axis=0)[:, None, :, :]   # OIHW (2,1,3,3)
    x = jax.lax.conv_general_dilated(
        img, w, window_strides=(1, 1), padding="VALID",
        dimension_numbers=("NCHW", "OIHW", "NCHW"))
    x = x * x
    x = jnp.sum(x, axis=1, keepdims=True)
    return jnp.sqrt(x)


if __name__ == "__main__":
    key = jax.random.PRNGKey(0)
    x = jax.random.normal(key, (2, 1, 16, 16), dtype=jnp.float32)

    out = sobel_pallas(x)
    jax.block_until_ready(out)

    ref = sobel_reference(x)
    assert out.shape == (2, 1, 14, 14), out.shape
    assert jnp.allclose(out, ref, atol=1e-4, rtol=1e-4), \
        float(jnp.max(jnp.abs(out - ref)))

    print("KERNEL_OK")
</pallas_src>

<mosaic_0001>
module attributes {stable_mosaic.version = 11 : i64} {
  func.func @_sobel_kernel(%arg0: i32, %arg1: memref<2x1x16x16xf32, #tpu.memory_space<vmem>>, %arg2: memref<2x1x14x16xf32, #tpu.memory_space<vmem>>) attributes {dimension_semantics = [#tpu.dimension_semantics<parallel>], iteration_bounds = array<i64: 1>, scalar_prefetch = 0 : i64, scratch_operands = 0 : i64, tpu.core_type = #tpu.core_type<tc>, window_params = [{transform_indices = @transform_0, window_bounds = array<i64: 2, 1, 16, 16>}, {transform_indices = @transform_1, window_bounds = array<i64: 2, 1, 14, 16>}]} {
    %c0 = arith.constant 0 : index
    %c0_0 = arith.constant 0 : index
    %c0_1 = arith.constant 0 : index
    %c0_2 = arith.constant 0 : index
    %0 = vector.load %arg1[%c0, %c0_0, %c0_1, %c0_2] : memref<2x1x16x16xf32, #tpu.memory_space<vmem>>, vector<2x1x16x16xf32>
    %1 = vector.extract_strided_slice %0 {offsets = [0, 0, 0, 0], sizes = [2, 1, 14, 16], strides = [1, 1, 1, 1]} : vector<2x1x16x16xf32> to vector<2x1x14x16xf32>
    %2 = vector.extract_strided_slice %0 {offsets = [0, 0, 1, 0], sizes = [2, 1, 14, 16], strides = [1, 1, 1, 1]} : vector<2x1x16x16xf32> to vector<2x1x14x16xf32>
    %3 = vector.extract_strided_slice %0 {offsets = [0, 0, 2, 0], sizes = [2, 1, 14, 16], strides = [1, 1, 1, 1]} : vector<2x1x16x16xf32> to vector<2x1x14x16xf32>
    %cst = arith.constant 2.000000e+00 : f32
    %4 = vector.broadcast %cst : f32 to vector<2x1x14x16xf32>
    %5 = arith.mulf %4, %2 : vector<2x1x14x16xf32>
    %6 = arith.addf %1, %5 : vector<2x1x14x16xf32>
    %7 = arith.addf %6, %3 : vector<2x1x14x16xf32>
    %8 = arith.subf %1, %3 : vector<2x1x14x16xf32>
    %9 = vector.extract_strided_slice %7 {offsets = [0, 0, 0, 2], sizes = [2, 1, 14, 14], strides = [1, 1, 1, 1]} : vector<2x1x14x16xf32> to vector<2x1x14x14xf32>
    %10 = vector.extract_strided_slice %7 {offsets = [0, 0, 0, 0], sizes = [2, 1, 14, 2], strides = [1, 1, 1, 1]} : vector<2x1x14x16xf32> to vector<2x1x14x2xf32>
    %11 = tpu.concatenate %9, %10 in 3 : vector<2x1x14x14xf32>, vector<2x1x14x2xf32> -> vector<2x1x14x16xf32>
    %12 = arith.subf %7, %11 : vector<2x1x14x16xf32>
    %13 = vector.extract_strided_slice %8 {offsets = [0, 0, 0, 1], sizes = [2, 1, 14, 15], strides = [1, 1, 1, 1]} : vector<2x1x14x16xf32> to vector<2x1x14x15xf32>
    %14 = vector.extract_strided_slice %8 {offsets = [0, 0, 0, 0], sizes = [2, 1, 14, 1], strides = [1, 1, 1, 1]} : vector<2x1x14x16xf32> to vector<2x1x14x1xf32>
    %15 = tpu.concatenate %13, %14 in 3 : vector<2x1x14x15xf32>, vector<2x1x14x1xf32> -> vector<2x1x14x16xf32>
    %cst_3 = arith.constant 2.000000e+00 : f32
    %16 = vector.broadcast %cst_3 : f32 to vector<2x1x14x16xf32>
    %17 = arith.mulf %16, %15 : vector<2x1x14x16xf32>
    %18 = arith.addf %8, %17 : vector<2x1x14x16xf32>
    %19 = vector.extract_strided_slice %8 {offsets = [0, 0, 0, 2], sizes = [2, 1, 14, 14], strides = [1, 1, 1, 1]} : vector<2x1x14x16xf32> to vector<2x1x14x14xf32>
    %20 = vector.extract_strided_slice %8 {offsets = [0, 0, 0, 0], sizes = [2, 1, 14, 2], strides = [1, 1, 1, 1]} : vector<2x1x14x16xf32> to vector<2x1x14x2xf32>
    %21 = tpu.concatenate %19, %20 in 3 : vector<2x1x14x14xf32>, vector<2x1x14x2xf32> -> vector<2x1x14x16xf32>
    %22 = arith.addf %18, %21 : vector<2x1x14x16xf32>
    %23 = arith.mulf %12, %12 : vector<2x1x14x16xf32>
    %24 = arith.mulf %22, %22 : vector<2x1x14x16xf32>
    %25 = arith.addf %23, %24 : vector<2x1x14x16xf32>
    %26 = math.sqrt %25 : vector<2x1x14x16xf32>
    %cst_4 = arith.constant 2.000000e+00 : f32
    %27 = vector.broadcast %cst_4 : f32 to vector<2x1x14x16xf32>
    %28 = arith.mulf %27, %26 : vector<2x1x14x16xf32>
    %c0_5 = arith.constant 0 : index
    %c0_6 = arith.constant 0 : index
    %c0_7 = arith.constant 0 : index
    %c0_8 = arith.constant 0 : index
    %29 = vector.load %arg2[%c0_5, %c0_6, %c0_7, %c0_8] : memref<2x1x14x16xf32, #tpu.memory_space<vmem>>, vector<2x1x14x16xf32>
    tpu.vector_store %arg2[%c0_5, %c0_6, %c0_7, %c0_8], %28 {strides = array<i32>} : memref<2x1x14x16xf32, #tpu.memory_space<vmem>>, vector<2x1x14x16xf32>,
    return
  }
  func.func @transform_0(%arg0: i32) -> (i32, i32, i32, i32) {
    %c0_i32 = arith.constant 0 : i32
    %c0_i32_0 = arith.constant 0 : i32
    %c0_i32_1 = arith.constant 0 : i32
    %c0_i32_2 = arith.constant 0 : i32
    return %arg0, %c0_i32, %c0_i32_0, %c0_i32_1 : i32, i32, i32, i32
  }
  func.func @transform_1(%arg0: i32) -> (i32, i32, i32, i32) {
    %c0_i32 = arith.constant 0 : i32
    %c0_i32_0 = arith.constant 0 : i32
    %c0_i32_1 = arith.constant 0 : i32
    %c0_i32_2 = arith.constant 0 : i32
    return %arg0, %c0_i32, %c0_i32_0, %c0_i32_1 : i32, i32, i32, i32
  }
}

</mosaic_0001>

<bundles_post_ra>
// kernel: tpu_custom_call.1
= control target key start
LH: loop header
LB: loop body
LE: loop exit
PB: predicated region body
PF: predicated region fallthrough
CT: control target
= control target key end

     0   :  { %6 = vsyncpa [#allocation3], 0  ;;  %s276_s6 = smov [#allocation2]   ;;  %s369_s0 = inlined_call_operand.hbm [shape: f32[2,1,16,16], index: 0, kind: input, shape index: {}]   ;;  %s370_s1 = inlined_call_operand.vmem [shape: f32[2,1,14,16], index: 1, kind: output, shape index: {}]  }
   0x1   :  { %s12_s7 = sshll.u32 %s276_s6, 4  ;;  %s252_s10 = scalar_lea.hbm %s369_s0, 512  ;;  %s13_s7 = int_to_ptr.vmem [resolvable:$true] %s12_s7 }
   0x2   :  { %p253_p0 = scmp.ne.s32.totalorder %s369_s0, %s252_s10  ;;  %p256_p1 = scmp.lt.u32.totalorder %s252_s10, %s369_s0 }
   0x4   :  { %p258_p2 = pnand %p256_p1, %p253_p0 }
   0x6   :  { %261 = shalt.err (!%p258_p2)
}
   0x7   :  { %s262_s15 = scalar_lea.vmem %s13_s7, 512  ;;  %p267_p4 = scmp.lt.s32.totalorder %s13_s7, %s13_s7 }
   0x8   :  { %p263_p3 = scmp.ne.s32.totalorder %s13_s7, %s262_s15  ;;  %p268_p5 = scmp.lt.s32.totalorder %s262_s15, %s262_s15 }
   0xa   :  { %p269_p6 = por %p268_p5, %p267_p4 }
   0xc   :  { %p270_p7 = pnand %p269_p6, %p263_p3 }
   0xe   :  { %273 = shalt.err (!%p270_p7)
}
   0xf   :  { %s277_s16 = smov 128   ;;  %s278_s17 = smov 8  }
  0x10   :  { %18 = dma.hbm_to_vmem [thread:$0]  %s369_s0, 512, %s13_s7, [#allocation3], %s277_s16, %s277_s16, %s278_s17  }
  0x11   :  { %274 = dma.done.wait [#allocation3], 512  }
  0x12   :  { %275 = vsyncadd [#allocation3], 4294966784  ;;  %v25_v0 = vld [vmem:[#allocation2 + $0x18] sm:$0xff]  ;;  %v23_v1 = vld [vmem:[#allocation2 + $0x8] sm:$0xff]  ;;  %vm53_vm0 = vcmask 1045504   ;;  %s279_s20 = smov 127  }
  0x13   :  { %v22_v2 = vld [vmem:[#allocation2] sm:$0xff]  ;;  %v58_v3 = vrot.slane %v25_v0, 2  ;;  %v55_v4 = vrot.slane %v23_v1, 2  ;;  %v24_v6 = vld [vmem:[#allocation2 + $0x10] sm:$0xff]  ;;  %v27_v7 = vmul.f32 2.0, %v23_v1  ;;  %v29_v16 = vmul.f32 2.0, %v25_v0 }
  0x14   :  { %v54_v5 = vrot.slane %v22_v2, 2  ;;  %v26_v8 = vmul.f32 2.0, %v22_v2  ;;  %v57_v13 = vrot.slane %v24_v6, 2  ;;  %v28_v17 = vmul.f32 2.0, %v24_v6  ;;  %s280_s0 = smov 15   ;;  %s281_s21 = smov 126  }
  0x15   :  { %v305_v9 = vsub.f32 %v25_v0, %v58_v3  ;;  %v307_v10 = vsub.f32 %v23_v1, %v55_v4  ;;  %v36_v14 = vrot.slane %v27_v7, 1  ;;  %vm34_vm1 = vcmask 1046528   ;;  %s282_s22 = smov 14  }
  0x16   :  { %v56_v11 = vsel %vm53_vm0, %v54_v5, %v55_v4  ;;  %v35_v15 = vrot.slane %v26_v8, 1  ;;  %v59_v18 = vsel %vm53_vm0, %v57_v13, %v58_v3  ;;  %v39_v20 = vrot.slane %v29_v16, 1 }
  0x17   :  { %119 = vrot.lane.b32.xlu1 %v305_v9, %s279_s20  ;;  %115 = vrot.lane.b32.xlu0 %v307_v10, %s279_s20  ;;  %v312_v12 = vsub.f32 %v22_v2, %v56_v11  ;;  %v38_v21 = vrot.slane %v28_v17, 1  ;;  %v319_v22 = vsub.f32 %v24_v6, %v59_v18  ;;  %v46_v23 = vadd.f32 %v36_v14, %v23_v1 }
  0x18   :  { %v37_v19 = vsel %vm34_vm1, %v35_v15, %v36_v14  ;;  %v48_v26 = vadd.f32 %v39_v20, %v25_v0  ;;  %vm137_vm2 = vcmask 121856   ;;  %vm100_vm3 = vcmask 113664  }
  0x19   :  { %v45_v24 = vadd.f32 %v37_v19, %v22_v2  ;;  %v40_v25 = vsel %vm34_vm1, %v38_v21, %v39_v20  ;;  %v65_v27 = vadd.f32 %v55_v4, %v46_v23  ;;  %vm228_vm7 = vcmask 128000  }
  0x1a   :  { %v47_v29 = vadd.f32 %v40_v25, %v24_v6  ;;  %v323_v30 = vadd.f32 %v58_v3, %v48_v26  ;;  %vm226_vm9 = vcmask 130048  }
  0x1b   :  { %127 = vrot.lane.b32.xlu1 %v307_v10, %s280_s0  ;;  %113 = vrot.lane.b32.xlu0 %v312_v12, %s279_s20  ;;  %v64_v28 = vadd.f32 %v56_v11, %v45_v24 }
  0x1c   :  { %v325_v31 = vadd.f32 %v59_v18, %v47_v29 }
  0x1f   :  { %131 = vrot.lane.b32.xlu1 %v305_v9, %s280_s0  ;;  %125 = vrot.lane.b32.xlu0 %v312_v12, %s280_s0 }
  0x23   :  { %117 = vrot.lane.b32.xlu1 %v319_v22, %s279_s20  ;;  %129 = vrot.lane.b32.xlu0 %v319_v22, %s280_s0 }
  0x27   :  { %78 = vrot.lane.b32.xlu1 %v65_v27, %s281_s21  ;;  %76 = vrot.lane.b32.xlu0 %v64_v28, %s281_s21 }
  0x2b   :  { %82 = vrot.lane.b32.xlu1 %v323_v30, %s281_s21  ;;  %80 = vrot.lane.b32.xlu0 %v325_v31, %s281_s21 }
  0x2f   :  { %90 = vrot.lane.b32.xlu1 %v65_v27, %s282_s22  ;;  %88 = vrot.lane.b32.xlu0 %v64_v28, %s282_s22 }
  0x33   :  { %94 = vrot.lane.b32.xlu1 %v323_v30, %s282_s22  ;;  %92 = vrot.lane.b32.xlu0 %v325_v31, %s282_s22 }
  0x37   :  { %152 = vrot.lane.b32.xlu1 %v307_v10, %s281_s21  ;;  %150 = vrot.lane.b32.xlu0 %v312_v12, %s281_s21 }
  0x3b   :  { %156 = vrot.lane.b32.xlu1 %v305_v9, %s281_s21  ;;  %154 = vrot.lane.b32.xlu0 %v319_v22, %s281_s21 }
  0x3f   :  { %164 = vrot.lane.b32.xlu1 %v307_v10, %s282_s22  ;;  %162 = vrot.lane.b32.xlu0 %v312_v12, %s282_s22 }
  0x43   :  { %168 = vrot.lane.b32.xlu1 %v305_v9, %s282_s22  ;;  %166 = vrot.lane.b32.xlu0 %v319_v22, %s282_s22 }
  0x89   :  { %v120_v32 = vpop.permute.xlu1 %119  ;;  %v116_v33 = vpop.permute.xlu0 %115 }
  0x8d   :  { %v128_v34 = vpop.permute.xlu1 %127  ;;  %v114_v35 = vpop.permute.xlu0 %113 }
  0x8e   :  { %v139_v50 = vsel %vm137_vm2, %v116_v33, %v128_v34 }
  0x8f   :  { %v143_v52 = vmul.f32 2.0, %v139_v50 }
  0x91   :  { %v132_v36 = vpop.permute.xlu1 %131  ;;  %v126_v37 = vpop.permute.xlu0 %125  ;;  %v147_v62 = vadd.f32 %v143_v52, %v307_v10 }
  0x92   :  { %v138_v51 = vsel %vm137_vm2, %v114_v35, %v126_v37  ;;  %v141_v53 = vsel %vm137_vm2, %v120_v32, %v132_v36 }
  0x93   :  { %v142_v54 = vmul.f32 2.0, %v138_v51  ;;  %v145_v60 = vmul.f32 2.0, %v141_v53 }
  0x95   :  { %v118_v38 = vpop.permute.xlu1 %117  ;;  %v130_v39 = vpop.permute.xlu0 %129  ;;  %v146_v63 = vadd.f32 %v142_v54, %v312_v12  ;;  %v149_v13 = vadd.f32 %v145_v60, %v305_v9 }
  0x96   :  { %v140_v55 = vsel %vm137_vm2, %v118_v38, %v130_v39 }
  0x97   :  { %v144_v61 = vmul.f32 2.0, %v140_v55 }
  0x99   :  { %v79_v40 = vpop.permute.xlu1 %78  ;;  %v77_v41 = vpop.permute.xlu0 %76  ;;  %v148_v10 = vadd.f32 %v144_v61, %v319_v22 }
  0x9d   :  { %v83_v42 = vpop.permute.xlu1 %82  ;;  %v81_v43 = vpop.permute.xlu0 %80 }
  0xa1   :  { %v91_v44 = vpop.permute.xlu1 %90  ;;  %v89_v45 = vpop.permute.xlu0 %88 }
  0xa2   :  { %v102_v58 = vsel %vm100_vm3, %v79_v40, %v91_v44  ;;  %v101_v59 = vsel %vm100_vm3, %v77_v41, %v89_v45 }
  0xa3   :  { %v106_v0 = vsub.f32 %v65_v27, %v102_v58  ;;  %v105_v1 = vsub.f32 %v64_v28, %v101_v59 }
  0xa5   :  { %v95_v46 = vpop.permute.xlu1 %94  ;;  %v93_v47 = vpop.permute.xlu0 %92  ;;  %v183_v14 = vmul.f32 %v106_v0, %v106_v0  ;;  %v182_v12 = vmul.f32 %v105_v1, %v105_v1 }
  0xa6   :  { %v104_v6 = vsel %vm100_vm3, %v83_v42, %v95_v46  ;;  %v103_v7 = vsel %vm100_vm3, %v81_v43, %v93_v47 }
  0xa7   :  { %v108_v19 = vsub.f32 %v323_v30, %v104_v6  ;;  %v107_v20 = vsub.f32 %v325_v31, %v103_v7 }
  0xa9   :  { %v153_v48 = vpop.permute.xlu1 %152  ;;  %v151_v49 = vpop.permute.xlu0 %150  ;;  %v185_v22 = vmul.f32 %v108_v19, %v108_v19  ;;  %v184_v27 = vmul.f32 %v107_v20, %v107_v20 }
  0xad   :  { %v157_v56 = vpop.permute.xlu1 %156  ;;  %v155_v57 = vpop.permute.xlu0 %154 }
  0xb1   :  { %v165_v2 = vpop.permute.xlu1 %164  ;;  %v163_v3 = vpop.permute.xlu0 %162 }
  0xb2   :  { %v175_v4 = vsel %vm100_vm3, %v153_v48, %v165_v2  ;;  %v174_v5 = vsel %vm100_vm3, %v151_v49, %v163_v3 }
  0xb3   :  { %v179_v8 = vadd.f32 %v175_v4, %v147_v62  ;;  %v178_v11 = vadd.f32 %v174_v5, %v146_v63 }
  0xb5   :  { %v187_v15 = vmul.f32 %v179_v8, %v179_v8  ;;  %v186_v16 = vmul.f32 %v178_v11, %v178_v11  ;;  %v169_v17 = vpop.permute.xlu1 %168  ;;  %v167_v18 = vpop.permute.xlu0 %166 }
  0xb6   :  { %v177_v21 = vsel %vm100_vm3, %v157_v56, %v169_v17  ;;  %v176_v23 = vsel %vm100_vm3, %v155_v57, %v167_v18 }
  0xb7   :  { %v191_v24 = vadd.f32 %v187_v15, %v183_v14  ;;  %v190_v25 = vadd.f32 %v186_v16, %v182_v12  ;;  %v181_v26 = vadd.f32 %v177_v21, %v149_v13  ;;  %v180_v9 = vadd.f32 %v176_v23, %v148_v10 }
  0xb9   :  { %244 = vrsqrt.f32 %v191_v24  ;;  %v189_v28 = vmul.f32 %v181_v26, %v181_v26  ;;  %v188_v29 = vmul.f32 %v180_v9, %v180_v9  ;;  %vm203_vm4 = vcmp.eq.f32.partialorder %v191_v24, inf }
  0xba   :  { %246 = vrsqrt.f32 %v190_v25  ;;  %v206_v35 = vand.u32 2147483648, %v191_v24  ;;  %vm205_vm5 = vcmp.eq.f32.partialorder %v191_v24, 0.0  ;;  %vm196_vm6 = vcmp.eq.f32.partialorder %v190_v25, inf }
  0xbb   :  { %v193_v32 = vadd.f32 %v189_v28, %v185_v22  ;;  %v192_v33 = vadd.f32 %v188_v29, %v184_v27  ;;  %v199_v38 = vand.u32 2147483648, %v190_v25  ;;  %vm198_vm8 = vcmp.eq.f32.partialorder %v190_v25, 0.0 }
  0xbd   :  { %248 = vrsqrt.f32 %v193_v32  ;;  %vm217_vm10 = vcmp.eq.f32.partialorder %v193_v32, inf  ;;  %v220_v47 = vand.u32 2147483648, %v193_v32  ;;  %vm219_vm11 = vcmp.eq.f32.partialorder %v193_v32, 0.0 }
  0xbe   :  { %250 = vrsqrt.f32 %v192_v33  ;;  %vm210_vm12 = vcmp.eq.f32.partialorder %v192_v33, inf  ;;  %v213_v50 = vand.u32 2147483648, %v192_v33  ;;  %vm212_vm13 = vcmp.eq.f32.partialorder %v192_v33, 0.0 }
  0xc3   :  { %v245_v30 = vpop.eup %244 }
  0xc4   :  { %v247_v31 = vpop.eup %246  ;;  %v202_v34 = vmul.f32 %v245_v30, %v191_v24 }
  0xc5   :  { %v195_v36 = vmul.f32 %v247_v31, %v190_v25 }
  0xc6   :  { %v204_v37 = vsel %vm203_vm4, %v191_v24, %v202_v34 }
  0xc7   :  { %v207_v39 = vsel %vm205_vm5, %v206_v35, %v204_v37  ;;  %v197_v40 = vsel %vm196_vm6, %v190_v25, %v195_v36  ;;  %v249_v43 = vpop.eup %248 }
  0xc8   :  { %v223_v41 = vmul.f32 2.0, %v207_v39  ;;  %v200_v42 = vsel %vm198_vm8, %v199_v38, %v197_v40  ;;  %v251_v45 = vpop.eup %250  ;;  %v216_v46 = vmul.f32 %v249_v43, %v193_v32 }
  0xc9   :  { %v222_v44 = vmul.f32 2.0, %v200_v42  ;;  %v209_v48 = vmul.f32 %v251_v45, %v192_v33 }
  0xca   :  { %229 = vst.msk [vmem:[%s370_s1 + $0x8] sm:$0x3f] %vm228_vm7, %v223_v41  ;;  %v218_v49 = vsel %vm217_vm10, %v193_v32, %v216_v46 }
  0xcb   :  { %227 = vst.msk [vmem:[%s370_s1] sm:$0xff] %vm226_vm9, %v222_v44  ;;  %v221_v51 = vsel %vm219_vm11, %v220_v47, %v218_v49  ;;  %v211_v52 = vsel %vm210_vm12, %v192_v33, %v209_v48 }
  0xcc   :  { %v225_v53 = vmul.f32 2.0, %v221_v51  ;;  %v214_v54 = vsel %vm212_vm13, %v213_v50, %v211_v52 }
  0xcd   :  { %v224_v55 = vmul.f32 2.0, %v214_v54 }
  0xce   :  { %231 = vst.msk [vmem:[%s370_s1 + $0x18] sm:$0x3f] %vm228_vm7, %v225_v53 }
  0xcf   :  { %230 = vst.msk [vmem:[%s370_s1 + $0x10] sm:$0xff] %vm226_vm9, %v224_v55 }
  0xd0   :  { %236 = vsyncpa [#allocation3], 1 }

</bundles_post_ra>
